<compile_context>
chip_gen: v6e
topology: v6e:2x2x1
jax: 0.10.0
libtpu: 0.0.40
codegen_flags: <defaults>
</compile_context>

<pallas_src>
import jax
import jax.numpy as jnp
from jax.experimental import pallas as pl
from jax.experimental.pallas import tpu as pltpu


def _round_up(a, m):
    return ((a + m - 1) // m) * m


def taskhead_kernel(w_ref, bias_ref, x_ref, o_ref):
    # w_ref:    (K, G)  f32 VMEM  -- folded block-diagonal weights, resident across the grid
    # bias_ref: (1,)    f32 SMEM  -- folded scalar bias
    # x_ref:    (TB, K) VMEM      -- input tile in x's own dtype (f32 or bf16)
    # o_ref:    (TB, G) f32 VMEM  -- contiguous output tile (G == full last dim)
    xt = x_ref[...].astype(jnp.float32)            # in-kernel upcast (v5e-safe), f32 accumulation
    o_ref[...] = (jnp.dot(xt, w_ref[...], preferred_element_type=jnp.float32)
                  + bias_ref[0])


def fold_taskhead_weights(conv_w, conv_b, lin_w, lin_b):
    """Fold Conv1d(1->E, k=3, circular) + Linear(E*E -> 1) into (veff (E,), bias ())."""
    E = conv_w.shape[0]
    f32 = jnp.float32
    WL = lin_w.reshape(E, E).astype(f32)           # WL[c, i] = lin_w[0, c*E + i]
    w = conv_w[:, 0, :].astype(f32)                # (E, 3): conv taps per output channel c
    veff = (jnp.sum(w[:, 0:1] * jnp.roll(WL, -1, axis=1), axis=0)    # tap 0 -> x[(j+1) % E]
            + jnp.sum(w[:, 1:2] * WL, axis=0)                        # tap 1 -> x[j]
            + jnp.sum(w[:, 2:3] * jnp.roll(WL, 1, axis=1), axis=0))  # tap 2 -> x[(j-1) % E]
    bias = lin_b.astype(f32)[0] + jnp.sum(conv_b.astype(f32)[:, None] * WL)
    return veff, bias


def taskhead_forward(x, conv_w, conv_b, lin_w, lin_b, *, block_rows=4096):
    """x: (B, E). conv_w: (E,1,3). conv_b: (E,). lin_w: (1, E*E). lin_b: (1,).  Returns (B,1) f32."""
    B, E = x.shape
    f32 = jnp.float32
    veff, bias = fold_taskhead_weights(conv_w, conv_b, lin_w, lin_b)
    bias_s = bias.reshape(1)

    # ---- lay x out as a lane-dense 2-D slab (no transpose, no full-size zero buffer) ----
    if 128 % E == 0:
        g = 128 // E                                   # batches per 128-lane row
        rem = B % g
        if rem:                                        # pad at most g-1 rows (none if B % g == 0)
            x = jnp.pad(x, ((0, g - rem), (0, 0)))
        x2 = x.reshape(-1, 128)                        # free row-major reshape -> (R, 128)
        # Block-diagonal folded weights: W[k*E + j, k] = veff[j].
        W = jnp.kron(jnp.eye(g, dtype=f32), veff.reshape(E, 1))         # (128, g)
    else:
        # TODO(synk): generic-E fallback pads the feature dim to a multiple of 128 (costs one
        # extra copy of x); the zero-copy fast path above covers E in {1,2,4,8,16,32,64,128}.
        Ep = _round_up(E, 128)
        x2 = jnp.pad(x, ((0, 0), (0, Ep - E)))                          # (B, Ep)
        W = jnp.pad(veff, (0, Ep - E)).reshape(Ep, 1)                   # (Ep, 1)

    R, K = x2.shape
    G = W.shape[1]

    # ---- batch-row tiling: big tiles amortize the ~0.35 us/step overhead; keep >= 2 grid steps
    #      when possible so the "parallel" axis shards across v7x's two TensorCores ----
    sub = {4: 8, 2: 16, 1: 32}.get(x2.dtype.itemsize, 8)   # sublane packing of x's dtype
    if R <= sub:
        tb = R                                             # block equals full dim (allowed)
    else:
        tb = min(_round_up(block_rows, sub), _round_up(pl.cdiv(R, 2), sub))
    grid = (pl.cdiv(R, tb),)                               # partial tail block handled by Pallas

    out2 = pl.pallas_call(
        taskhead_kernel,
        out_shape=jax.ShapeDtypeStruct((R, G), f32),
        grid=grid,
        in_specs=[
            pl.BlockSpec(memory_space=pltpu.MemorySpace.VMEM),     # W: tiny resident VMEM operand
            pl.BlockSpec(memory_space=pltpu.MemorySpace.SMEM),     # bias: SMEM scalar
            pl.BlockSpec((tb, K), lambda i: (i, 0)),               # x tile: contiguous, lane-dense
        ],
        out_specs=pl.BlockSpec((tb, G), lambda i: (i, 0)),         # contiguous (spans full last dim)
        compiler_params=pltpu.CompilerParams(
            dimension_semantics=("parallel",)),                    # shard batch rows across TCs
        cost_estimate=pl.CostEstimate(
            flops=2 * R * K * G,
            transcendentals=0,
            bytes_accessed=R * K * x2.dtype.itemsize + (R * G + K * G + 1) * 4),
    )(W, bias_s, x2)

    # Padded / tail rows (if any) hold `bias` or are never written; they are sliced away here.
    return out2.reshape(-1)[:B].reshape(B, 1)


def taskhead_reference(x, conv_w, conv_b, lin_w, lin_b):
    """Pure-JAX reference mirroring the PyTorch module literally."""
    B, E = x.shape
    xp = jnp.concatenate([x[:, -1:], x, x[:, :1]], axis=1)            # circular pad -> (B, E+2)
    cols = jnp.stack([xp[:, i:i + 3] for i in range(E)], axis=1)      # (B, E, 3)
    conv = jnp.einsum("bik,ck->bci", cols, conv_w[:, 0, :]) + conv_b[None, :, None]  # (B, E, E)
    flat = conv.reshape(B, E * E)
    return flat @ lin_w.T + lin_b[None, :]                            # (B, 1)


if __name__ == "__main__":
    # B deliberately not a multiple of 8 or 128: exercises the tiny tail pad, a partial tail
    # block, and a 2-step grid.
    B, E = 300, 16

    key = jax.random.PRNGKey(0)
    k_x, k_cw, k_cb, k_lw, k_lb = jax.random.split(key, 5)

    x = jax.random.normal(k_x, (B, E), dtype=jnp.float32)
    conv_w = jax.random.normal(k_cw, (E, 1, 3), dtype=jnp.float32) * 0.5   # Conv1d weight
    conv_b = jax.random.normal(k_cb, (E,), dtype=jnp.float32) * 0.1        # Conv1d bias
    lin_w = jax.random.normal(k_lw, (1, E * E), dtype=jnp.float32) * 0.05  # Linear weight
    lin_b = jax.random.normal(k_lb, (1,), dtype=jnp.float32) * 0.1         # Linear bias

    fwd = jax.jit(taskhead_forward, static_argnames=("block_rows",))

    # f32 path
    out = jax.block_until_ready(fwd(x, conv_w, conv_b, lin_w, lin_b))
    ref = taskhead_reference(x, conv_w, conv_b, lin_w, lin_b)
    assert out.shape == (B, 1) and out.dtype == jnp.float32
    assert jnp.allclose(out, ref, rtol=1e-4, atol=1e-4)

    # bf16 input path: DMA'd narrow (half the HBM bytes), upcast to f32 inside the kernel.
    x_bf16 = x.astype(jnp.bfloat16)
    out_bf = jax.block_until_ready(fwd(x_bf16, conv_w, conv_b, lin_w, lin_b))
    ref_bf = taskhead_reference(x_bf16.astype(jnp.float32), conv_w, conv_b, lin_w, lin_b)
    assert jnp.allclose(out_bf, ref_bf, rtol=1e-4, atol=1e-4)

    print("KERNEL_OK")
</pallas_src>

<mosaic_0001>
module attributes {stable_mosaic.version = 11 : i64} {
  func.func @taskhead_kernel(%arg0: i32, %arg1: memref<128x8xf32, #tpu.memory_space<vmem>>, %arg2: memref<1xf32, #tpu.memory_space<smem>>, %arg3: memref<24x128xf32, #tpu.memory_space<vmem>>, %arg4: memref<24x8xf32, #tpu.memory_space<vmem>>) attributes {dimension_semantics = [#tpu.dimension_semantics<parallel>], iteration_bounds = array<i64: 2>, scalar_prefetch = 0 : i64, scratch_operands = 0 : i64, tpu.core_type = #tpu.core_type<tc>, window_params = [{pipeline_mode = #tpu.pipeline_mode<synchronous>, transform_indices = @transform_0, window_bounds = array<i64: 128, 8>}, {transform_indices = @transform_1, window_bounds = array<i64: 1>}, {transform_indices = @transform_2, window_bounds = array<i64: 24, 128>}, {transform_indices = @transform_3, window_bounds = array<i64: 24, 8>}]} {
    %c0 = arith.constant 0 : index
    %c0_0 = arith.constant 0 : index
    %0 = vector.load %arg3[%c0, %c0_0] : memref<24x128xf32, #tpu.memory_space<vmem>>, vector<24x128xf32>
    %c0_1 = arith.constant 0 : index
    %c0_2 = arith.constant 0 : index
    %1 = vector.load %arg1[%c0_1, %c0_2] : memref<128x8xf32, #tpu.memory_space<vmem>>, vector<128x8xf32>
    %cst = arith.constant dense<0.000000e+00> : vector<24x8xf32>
    %2 = tpu.matmul %0, %1, %cst {dimension_numbers = #tpu.dot_dimension_numbers<[1], [0], [0], [1], [0, 0, 1, 1], [], []>} : vector<24x128xf32>, vector<128x8xf32>, vector<24x8xf32> -> vector<24x8xf32>
    %c0_3 = arith.constant 0 : index
    %3 = memref.load %arg2[%c0_3] : memref<1xf32, #tpu.memory_space<smem>>
    %4 = vector.broadcast %3 : f32 to vector<24x8xf32>
    %5 = arith.addf %2, %4 : vector<24x8xf32>
    %c0_4 = arith.constant 0 : index
    %c0_5 = arith.constant 0 : index
    %6 = vector.load %arg4[%c0_4, %c0_5] : memref<24x8xf32, #tpu.memory_space<vmem>>, vector<24x8xf32>
    tpu.vector_store %arg4[%c0_4, %c0_5], %5 {strides = array<i32>} : memref<24x8xf32, #tpu.memory_space<vmem>>, vector<24x8xf32>,
    return
  }
  func.func @transform_0(%arg0: i32) -> (i32, i32) {
    %c0_i32 = arith.constant 0 : i32
    %c0_i32_0 = arith.constant 0 : i32
    %c0_i32_1 = arith.constant 0 : i32
    return %c0_i32, %c0_i32_0 : i32, i32
  }
  func.func @transform_1(%arg0: i32) -> i32 {
    %c0_i32 = arith.constant 0 : i32
    %c0_i32_0 = arith.constant 0 : i32
    return %c0_i32 : i32
  }
  func.func @transform_2(%arg0: i32) -> (i32, i32) {
    %c0_i32 = arith.constant 0 : i32
    %c0_i32_0 = arith.constant 0 : i32
    return %arg0, %c0_i32 : i32, i32
  }
  func.func @transform_3(%arg0: i32) -> (i32, i32) {
    %c0_i32 = arith.constant 0 : i32
    %c0_i32_0 = arith.constant 0 : i32
    return %arg0, %c0_i32 : i32, i32
  }
}

</mosaic_0001>

<bundles_post_ra>
// kernel: taskhead_forward.1
= control target key start
LH: loop header
LB: loop body
LE: loop exit
PB: predicated region body
PF: predicated region fallthrough
CT: control target
= control target key end

     0   :  { %s1005_s0 = inlined_call_operand.vmem [shape: f32[128,8], index: 0, kind: input, shape index: {}]   ;;  %s1006_s1 = inlined_call_operand.<no memory space> [shape: f32[1], index: 1, kind: input, shape index: {}]   ;;  %s1007_s2 = inlined_call_operand.vmem [shape: f32[38,128], index: 2, kind: input, shape index: {}]   ;;  %s1008_s3 = inlined_call_operand.vmem [shape: f32[38,8], index: 3, kind: output, shape index: {}]  }
   0x1   :  { %8 = sst [smem:[#allocation2]] %s1006_s1 }
   0x2   :  { %s843_s14 = smov 0   ;;  %s845_s15 = smov 0  }
   0x3   :  { %s847_s16 = smov 0  }
   0x4 LB: > { %s856_s1 = sadd.s32 4294967295, %s784_s16   ;;  %s858_s17 = sadd.s32 1, %s784_s16   ;;  %s784_s16 = sphi %s847_s16, %s1012_s16   ;;  %s780_s15 = sphi %s845_s15, %s1011_s15   ;;  %s776_s14 = sphi %s843_s14, %s1010_s14  }
   0x5   : > { %s86_s18 = ssub.s32 %s784_s16, %s858_s17  ;;  %s89_s19 = sadd.s32 1, %s780_s15 }
   0x6   : > { %p87_p0 = scmp.eq.s32.totalorder %s86_s18, 0  ;;  %p99_p1 = scmp.ne.s32.totalorder %s780_s15, %s776_s14 }
   0x7   : > { %p100_p2 = scmp.eq.s32.totalorder %s856_s1, 1  ;;  %p527_p3 = scmp.ge.s32.totalorder %s784_s16, 1 }
   0x8   : > { %s866_s20 = scalar_select %p87_p0, %s780_s15, %s89_s19  }
   0x9   : > { %p868_p4 = por %p100_p2, %p99_p1  ;;  %p147_p5 = scmp.lt.s32.totalorder %s784_s16, 3 }
   0xb   : > { %p148_p6 = pnand %p527_p3, %p147_p5 }
   0xc   : > { %s906_s9 = smul.u32 (!%p148_p6), 3, %s856_s1  ;;  %s212_s12 = sld [smem:[#allocation2]] (!%p148_p6) }
   0xd   : > { %151 = sbr.rel (%p148_p6) target bundleno = 304 (0x130), region = 32  ;;  %s171_s13 = sand.u32 (!%p148_p6), 1, %s776_s14  }
   0xe   : > { %p179_p7 = scmp.lt.s32.totalorder (!%p148_p6), %s906_s9, 4  ;;  %s634_s16 = smul.u32 (!%p148_p6), 24, %s171_s13 }
  0x10   : > { %s964_s18 = scalar_lea.vmem (!%p148_p6), [#allocation3], %s634_s16  }
  0x12   : > { %v211_v0 = vld [vmem:[%s1005_s0 + $0x78] sm:$0xff]  ;;  %v818_v1 = vmov 0.0   ;;  %v210_v2 = vld [vmem:[%s1005_s0 + $0x70] sm:$0xff]  ;;  %v209_v3 = vld [vmem:[%s1005_s0 + $0x68] sm:$0xff]  ;;  %s180_s23 = scalar_select %p179_p7, %s906_s9, 4  ;;  %vm819_vm0 = vmmov 0   ;;  %v213_v20 = vstv %s212_s12 }
  0x13   : > { %602 = vmatprep.subr.mxu1 %v818_v1  ;;  %561 = vmatprep.subr.mxu0 %v818_v1  ;;  %v208_v4 = vld [vmem:[%s1005_s0 + $0x60] sm:$0xff]  ;;  %v207_v5 = vld [vmem:[%s1005_s0 + $0x58] sm:$0xff]  ;;  %v206_v6 = vld [vmem:[%s1005_s0 + $0x50] sm:$0xff]  ;;  %vm294_vm1 = vcmask 64512   ;;  %s306_s14 = ssub.s32 (%p868_p4), 5, %s906_s9  ;;  %s541_s19 = smul.u32 (%p868_p4), 24, %s856_s1 }
  0x14   : > { %618 = vmatpush3.msra.mxu1 %v211_v0  ;;  %562 = vmatpush3.msra.mxu0 %v211_v0  ;;  %v205_v7 = vld [vmem:[%s1005_s0 + $0x48] sm:$0xff]  ;;  %v204_v8 = vld [vmem:[%s1005_s0 + $0x40] sm:$0xff]  ;;  %v203_v9 = vld [vmem:[%s1005_s0 + $0x38] sm:$0xff]  ;;  %s528_s28 = sshll.u32 %s180_s23, 3  ;;  %p307_p8 = scmp.lt.s32.totalorder (%p868_p4), %s306_s14, 3 }
  0x15   : > { %603 = vmatprep.subr.mxu1 %v818_v1  ;;  %563 = vmatprep.subr.mxu0 %v818_v1  ;;  %v202_v10 = vld [vmem:[%s1005_s0 + $0x30] sm:$0xff]  ;;  %v201_v11 = vld [vmem:[%s1005_s0 + $0x28] sm:$0xff]  ;;  %v200_v12 = vld [vmem:[%s1005_s0 + $0x20] sm:$0xff]  ;;  %s182_s8 = scalar_lea.vmem %s1007_s2, %s528_s28  ;;  %s976_s24 = scalar_lea.vmem (%p868_p4), %s1008_s3, %s541_s19  }
  0x16   : > { %619 = vmatpush3.msra.mxu1 %v210_v2  ;;  %564 = vmatpush3.msra.mxu0 %v210_v2  ;;  %v199_v13 = vld [vmem:[%s1005_s0 + $0x18] sm:$0xff]  ;;  %v198_v14 = vld [vmem:[%s1005_s0 + $0x10] sm:$0xff]  ;;  %v197_v15 = vld [vmem:[%s1005_s0 + $0x8] sm:$0xff] }
  0x17   : > { %604 = vmatprep.subr.mxu1 %v818_v1  ;;  %565 = vmatprep.subr.mxu0 %v818_v1  ;;  %v196_v16 = vld [vmem:[%s1005_s0] sm:$0xff]  ;;  %v194_v17 = vld [vmem:[%s182_s8 + $0x8] sm:$0xff]  ;;  %v195_v19 = vld [vmem:[%s182_s8 + $0x10] sm:$0xff] }
  0x18   : > { %620 = vmatpush3.msra.mxu1 %v209_v3  ;;  %566 = vmatpush3.msra.mxu0 %v209_v3  ;;  %v193_v18 = vld [vmem:[%s182_s8] sm:$0xff] }
  0x19   : > { %605 = vmatprep.subr.mxu1 %v818_v1  ;;  %567 = vmatprep.subr.mxu0 %v818_v1 }
  0x1a   : > { %621 = vmatpush3.msra.mxu1 %v208_v4  ;;  %568 = vmatpush3.msra.mxu0 %v208_v4 }
  0x1b   : > { %606 = vmatprep.subr.mxu1 %v818_v1  ;;  %569 = vmatprep.subr.mxu0 %v818_v1 }
  0x1c   : > { %622 = vmatpush3.msra.mxu1 %v207_v5  ;;  %570 = vmatpush3.msra.mxu0 %v207_v5 }
  0x1d   : > { %607 = vmatprep.subr.mxu1 %v818_v1  ;;  %571 = vmatprep.subr.mxu0 %v818_v1 }
  0x1e   : > { %623 = vmatpush3.msra.mxu1 %v206_v6  ;;  %572 = vmatpush3.msra.mxu0 %v206_v6 }
  0x1f   : > { %608 = vmatprep.subr.mxu1 %v818_v1  ;;  %573 = vmatprep.subr.mxu0 %v818_v1 }
  0x20   : > { %624 = vmatpush3.msra.mxu1 %v205_v7  ;;  %574 = vmatpush3.msra.mxu0 %v205_v7 }
  0x21   : > { %609 = vmatprep.subr.mxu1 %v818_v1  ;;  %575 = vmatprep.subr.mxu0 %v818_v1 }
  0x22   : > { %625 = vmatpush3.msra.mxu1 %v204_v8  ;;  %576 = vmatpush3.msra.mxu0 %v204_v8 }
  0x23   : > { %610 = vmatprep.subr.mxu1 %v818_v1  ;;  %577 = vmatprep.subr.mxu0 %v818_v1 }
  0x24   : > { %626 = vmatpush3.msra.mxu1 %v203_v9  ;;  %578 = vmatpush3.msra.mxu0 %v203_v9 }
  0x25   : > { %611 = vmatprep.subr.mxu1 %v818_v1  ;;  %579 = vmatprep.subr.mxu0 %v818_v1 }
  0x26   : > { %627 = vmatpush3.msra.mxu1 %v202_v10  ;;  %580 = vmatpush3.msra.mxu0 %v202_v10 }
  0x27   : > { %612 = vmatprep.subr.mxu1 %v818_v1  ;;  %581 = vmatprep.subr.mxu0 %v818_v1 }
  0x28   : > { %628 = vmatpush3.msra.mxu1 %v201_v11  ;;  %582 = vmatpush3.msra.mxu0 %v201_v11 }
  0x29   : > { %613 = vmatprep.subr.mxu1 %v818_v1  ;;  %583 = vmatprep.subr.mxu0 %v818_v1 }
  0x2a   : > { %629 = vmatpush3.msra.mxu1 %v200_v12  ;;  %584 = vmatpush3.msra.mxu0 %v200_v12 }
  0x2b   : > { %614 = vmatprep.subr.mxu1 %v818_v1  ;;  %585 = vmatprep.subr.mxu0 %v818_v1 }
  0x2c   : > { %630 = vmatpush3.msra.mxu1 %v199_v13  ;;  %586 = vmatpush3.msra.mxu0 %v199_v13 }
  0x2d   : > { %615 = vmatprep.subr.mxu1 %v818_v1  ;;  %587 = vmatprep.subr.mxu0 %v818_v1 }
  0x2e   : > { %631 = vmatpush3.msra.mxu1 %v198_v14  ;;  %588 = vmatpush3.msra.mxu0 %v198_v14 }
  0x2f   : > { %616 = vmatprep.subr.mxu1 %v818_v1  ;;  %589 = vmatprep.subr.mxu0 %v818_v1 }
  0x30   : > { %632 = vmatpush3.msra.mxu1 %v197_v15  ;;  %590 = vmatpush3.msra.mxu0 %v197_v15 }
  0x31   : > { %617 = vmatprep.subr.mxu1 %v818_v1  ;;  %596 = vmatprep.mubr.msk.f32.mxu1 %vm819_vm0, %v818_v1 }
  0x32   : > { %633 = vmatpush3.msra.mxu1 %v196_v16  ;;  %591 = vmatprep.subr.mxu0 %v818_v1 }
  0x33   : > { %597 = vmatmul.mubr.f32.vlgmr.msra.gmra.mxu1 %v194_v17  ;;  %592 = vmatpush3.msra.mxu0 %v196_v16 }
  0x34   : > { %593 = vmatprep.mubr.msk.f32.mxu0 %vm819_vm0, %v818_v1  ;;  %599 = vmatprep.mubr.msk.f32.mxu1 %vm819_vm0, %v818_v1 }
  0x35   : > { %594 = vmatmul.mubr.f32.vlgmr.msra.gmra.mxu0 %v193_v18 }
  0x37   : > { %600 = vmatmul.mubr.f32.gmra.mxu1 %v195_v19 }
  0xf3   : > { %v285_v21 = vpop.f32.mrf.mxu1 }
  0xf4   : > { %v286_v22 = vadd.f32 %v285_v21, %v213_v20 }
  0xf5   : > { %v280_v23 = vpop.f32.mrf.mxu0  ;;  %v598_v24 = vpop.f32.mrf.mxu1 }
  0xf6   : > { %296 = vst.msk [vmem:[%s964_s18 + $0x8] sm:$0xff] %vm294_vm1, %v286_v22  ;;  %v281_v25 = vadd.f32 %v280_v23, %v213_v20  ;;  %304 = sbr.rel (!%p868_p4) target bundleno = 304 (0x130), region = 36 }
  0xf7   : > { %v595_v26 = vpop.f32.mrf.mxu0  ;;  %v290_v27 = vpop.f32.mrf.mxu1 }
  0xf8   : > { %295 = vst.msk [vmem:[%s964_s18] sm:$0xff] %vm294_vm1, %v281_v25  ;;  %v291_v28 = vadd.f32 %v290_v27, %v213_v20 }
  0xf9   : > { %v601_v29 = vpop.f32.mrf.mxu1 }
  0xfa   : > { %297 = vst.msk [vmem:[%s964_s18 + $0x10] sm:$0xff] %vm294_vm1, %v291_v28 }
  0xfb   : > { %s1014_s14 = smov (!%p307_p8, %s306_s14), 3 }
  0xfc   : > { %s529_s25 = sshll.u32 %s1014_s14, 7 }
  0xfd   : > { %p532_p9 = scmp.eq.s32.totalorder %s529_s25, 0 }
  0xfe   : > { %726 = sdivrem.u32 (!%p532_p9), %s1014_s14, 3 }
  0xff   : > { %315 = sbr.rel (%p532_p9) target bundleno = 304 (0x130), region = 40 }
 0x107   : > { %s982_s21 = spop.drf %726 }
 0x108   : > { %p533_p10 = scmp.le.s32.totalorder %s982_s21, 0 }
 0x109   : > { %s786_s1 = smov (!%p533_p10), %s976_s24   ;;  %s790_s9 = smov (!%p533_p10), %s964_s18  }
 0x10a   : > { %480 = sbr.rel (%p533_p10) target bundleno = 279 (0x117), region = 116  ;;  %s794_s26 = smov (!%p533_p10), 0  }
 0x10b   : > { %s798_s27 = smov (!%p533_p10), 0  }
 0x10f LB: >> { %v384_v30 = vld [vmem:[%s792_s9] sm:$0xff]  ;;  %v386_v31 = vld [vmem:[%s792_s9 + $0x8] sm:$0xff]  ;;  %v388_v32 = vld [vmem:[%s792_s9 + $0x10] sm:$0xff]  ;;  %s390_s28 = sadd.s32 1, %s796_s26  ;;  %s378_s27 = sadd.s32 1, %s800_s27   ;;  %s800_s27 = sphi %s798_s27, %s378_s27   ;;  %s796_s26 = sphi %s794_s26, %s795_s26   ;;  %s792_s9 = sphi %s790_s9, %s395_s9   ;;  %s788_s1 = sphi %s786_s1, %s396_s1  }
 0x110   : >> { %385 = vst [vmem:[%s788_s1] sm:$0xff] %v384_v30  ;;  %387 = vst [vmem:[%s788_s1 + $0x8] sm:$0xff] %v386_v31  ;;  %p391_p11 = scmp.ge.s32.totalorder %s390_s28, %s982_s21  ;;  %p377_p12 = scmp.ge.s32.totalorder %s378_s27, %s982_s21 }
 0x111   : >> { %389 = vst [vmem:[%s788_s1 + $0x10] sm:$0xff] %v388_v32 }
 0x112   : >> { %s1016_s28 = smov (%p391_p11, %s390_s28), 0  ;;  %380 = sbr.rel (!%p377_p12) target bundleno = 271 (0x10f), region = 122 }
 0x113   : >> { %s393_s29 = smul.u32 24, %s1016_s28  ;;  %s795_s26 = smov %s1016_s28  }
 0x115   : >> { %s395_s9 = scalar_lea.vmem %s964_s18, %s393_s29 [#allocation3]   ;;  %s396_s1 = scalar_lea.vmem %s976_s24, %s393_s29  }
 0x117 PF: > { %728 = sdivrem.u32 %s1014_s14, 3 }
 0x118   : > { %s534_s30 = smul.u32 24, %s982_s21 }
 0x11a   : > { %s401_s4 = scalar_lea.vmem %s964_s18, %s534_s30 [#allocation3]   ;;  %s403_s5 = scalar_lea.vmem %s976_s24, %s534_s30  }
 0x120   : > { %s729_s6 = spop.drf %728 }
 0x121   : > { %p536_p13 = scmp.le.s32.totalorder %s729_s6, 0 }
 0x122   : > { %s802_s7 = smov (!%p536_p13), %s403_s5   ;;  %s806_s8 = smov (!%p536_p13), %s401_s4  }
 0x123   : > { %494 = sbr.rel (%p536_p13) target bundleno = 304 (0x130), region = 127  ;;  %s810_s10 = smov (!%p536_p13), 0  }
 0x124   : > { %s814_s11 = smov (!%p536_p13), 0  }
 0x128 LB: >> { %v413_v33 = vld [vmem:[%s808_s8] sm:$0xff]  ;;  %s415_s12 = sadd.s32 1, %s812_s10  ;;  %s407_s11 = sadd.s32 1, %s816_s11   ;;  %s816_s11 = sphi %s814_s11, %s407_s11   ;;  %s812_s10 = sphi %s810_s10, %s811_s10   ;;  %s808_s8 = sphi %s806_s8, %s420_s8   ;;  %s804_s7 = sphi %s802_s7, %s421_s7  }
 0x129   : >> { %414 = vst [vmem:[%s804_s7] sm:$0xff] %v413_v33  ;;  %p416_p0 = scmp.ge.s32.totalorder %s415_s12, %s729_s6  ;;  %p406_p1 = scmp.ge.s32.totalorder %s407_s11, %s729_s6 }
 0x12b   : >> { %s1018_s12 = smov (%p416_p0, %s415_s12), 0  ;;  %409 = sbr.rel (!%p406_p1) target bundleno = 296 (0x128), region = 133 }
 0x12c   : >> { %s537_s13 = sshll.u32 %s1018_s12, 3  ;;  %s811_s10 = smov %s1018_s12  }
 0x12d   : >> { %s420_s8 = scalar_lea.vmem %s401_s4, %s537_s13 [#allocation3]   ;;  %s421_s7 = scalar_lea.vmem %s403_s5, %s537_s13  }
 0x130 PF: > { %p11_p2 = scmp.ge.s32.totalorder %s858_s17, 4   ;;  %s1010_s14 = smov %s780_s15 }
 0x131   : > { %s1011_s15 = smov %s866_s20  ;;  %s1012_s16 = smov %s858_s17 }
 0x132   :  { %13 = sbr.rel (!%p11_p2) target bundleno = 4 (0x4), region = 144 }

</bundles_post_ra>
